<compile_context>
chip_gen: v7x
topology: tpu7x:2x2x1
jax: 0.10.0
libtpu: 0.0.40
codegen_flags: <defaults>
</compile_context>

<pallas_src>
import jax
import jax.numpy as jnp
from jax.experimental import pallas as pl
from jax.experimental.pallas import tpu as pltpu


NEG_SLOPE = 0.01   # nn.LeakyReLU default
HPAD = 128         # lane-dense padded width for hidden layers
OUT_PAD = 8        # padded width of the 2-wide output (one f32 sublane word)


def _leaky_relu(x):
    # Keep in f32 (v5e has no bf16 VALU path).
    return jnp.where(x >= 0, x, NEG_SLOPE * x)


def _round_up(x, m):
    return ((x + m - 1) // m) * m


def _pad2(a, rows, cols):
    return jnp.pad(a, ((0, rows - a.shape[0]), (0, cols - a.shape[1])))


def mlp_kernel(x_ref,
               w1_ref, b1_ref,
               w2_ref, b2_ref,
               w3_ref, b3_ref,
               w4_ref, b4_ref,
               o_ref):
    # x_ref: (TB, IN) f32 streamed from HBM; weights bf16; biases f32;
    # o_ref: (TB, OUT_PAD) f32 (narrow, contiguous writeback).
    x = x_ref[...].astype(jnp.bfloat16)      # in-register cast, hides under DMA

    h = jnp.dot(x, w1_ref[...], preferred_element_type=jnp.float32) + b1_ref[...]
    h = _leaky_relu(h)                       # Dropout(0.5) -> identity (eval mode)

    h = jnp.dot(h.astype(jnp.bfloat16), w2_ref[...],
                preferred_element_type=jnp.float32) + b2_ref[...]
    h = _leaky_relu(h)

    h = jnp.dot(h.astype(jnp.bfloat16), w3_ref[...],
                preferred_element_type=jnp.float32) + b3_ref[...]
    h = _leaky_relu(h)

    h = jnp.dot(h.astype(jnp.bfloat16), w4_ref[...],
                preferred_element_type=jnp.float32) + b4_ref[...]

    o_ref[...] = h                           # (TB, OUT_PAD) f32


def mlp_forward(x, params):
    """x: (B, C, L) float32 -> (B, 2) float32."""
    B = x.shape[0]
    x2d = x.reshape(B, -1)                   # Flatten (== view(B,1,-1) + Flatten)
    IN = x2d.shape[1]
    (w1, b1), (w2, b2), (w3, b3), (w4, b4) = params

    # --- Zero-pad layers to lane-dense widths; weights bf16, biases f32. ---
    w1p = _pad2(w1, IN, HPAD).astype(jnp.bfloat16)
    b1p = _pad2(b1, 1, HPAD).astype(jnp.float32)
    w2p = _pad2(w2, HPAD, HPAD).astype(jnp.bfloat16)
    b2p = _pad2(b2, 1, HPAD).astype(jnp.float32)
    w3p = _pad2(w3, HPAD, HPAD).astype(jnp.bfloat16)
    b3p = _pad2(b3, 1, HPAD).astype(jnp.float32)
    w4p = _pad2(w4, HPAD, OUT_PAD).astype(jnp.bfloat16)   # narrow output layer
    b4p = _pad2(b4, 1, OUT_PAD).astype(jnp.float32)

    # --- Batch tiling: big tiles (multiple of 16 for bf16 sublane packing), --
    # --- but keep >= 2 grid steps for v7x megacore when batch allows.       --
    TB = min(2048, _round_up(B, 16))
    if B >= 32:
        TB = min(TB, _round_up(pl.cdiv(B, 2), 16))
    Bp = _round_up(B, TB)
    x_in = x2d if Bp == B else jnp.pad(x2d, ((0, Bp - B), (0, 0)))

    grid = (Bp // TB,)

    # Advisory cost estimate (matches the real, reduced HBM footprint).
    flops = 2 * Bp * (IN * HPAD + HPAD * HPAD + HPAD * HPAD + HPAD * OUT_PAD)
    bytes_accessed = (
        Bp * IN * 4                                        # f32 input stream
        + (w1p.size + w2p.size + w3p.size + w4p.size) * 2  # bf16 weights
        + (b1p.size + b2p.size + b3p.size + b4p.size) * 4  # f32 biases
        + Bp * OUT_PAD * 4                                 # narrow f32 output
    )

    out = pl.pallas_call(
        mlp_kernel,
        out_shape=jax.ShapeDtypeStruct((Bp, OUT_PAD), jnp.float32),
        grid=grid,
        in_specs=[
            pl.BlockSpec((TB, IN), lambda i: (i, 0)),      # f32 activation stream
            pl.BlockSpec((IN, HPAD), lambda i: (0, 0)),    # resident weights
            pl.BlockSpec((1, HPAD), lambda i: (0, 0)),
            pl.BlockSpec((HPAD, HPAD), lambda i: (0, 0)),
            pl.BlockSpec((1, HPAD), lambda i: (0, 0)),
            pl.BlockSpec((HPAD, HPAD), lambda i: (0, 0)),
            pl.BlockSpec((1, HPAD), lambda i: (0, 0)),
            pl.BlockSpec((HPAD, OUT_PAD), lambda i: (0, 0)),
            pl.BlockSpec((1, OUT_PAD), lambda i: (0, 0)),
        ],
        out_specs=pl.BlockSpec((TB, OUT_PAD), lambda i: (i, 0)),
        compiler_params=pltpu.CompilerParams(
            dimension_semantics=("parallel",),             # megacore on v7x
        ),
        cost_estimate=pl.CostEstimate(
            flops=flops, transcendentals=0, bytes_accessed=bytes_accessed),
    )(x_in, w1p, b1p, w2p, b2p, w3p, b3p, w4p, b4p)

    return out[:B, :2]


def init_params(key, input_size):
    """Deterministic init mimicking nn.Linear (uniform +/- 1/sqrt(fan_in))."""
    dims = [(input_size, 64), (64, 64), (64, 32), (32, 2)]
    params = []
    for (fan_in, fan_out) in dims:
        key, kw, kb = jax.random.split(key, 3)
        bound = 1.0 / jnp.sqrt(jnp.float32(fan_in))
        w = jax.random.uniform(kw, (fan_in, fan_out), jnp.float32, -bound, bound)
        b = jax.random.uniform(kb, (1, fan_out), jnp.float32, -bound, bound)
        params.append((w, b))
    return params


def reference_forward(x, params):
    """Plain-JAX reference mirroring the kernel's bf16/f32 mixed precision."""
    h = x.reshape(x.shape[0], -1)
    (w1, b1), (w2, b2), (w3, b3), (w4, b4) = params

    def layer(h, w, b, act):
        y = jnp.dot(h.astype(jnp.bfloat16), w.astype(jnp.bfloat16),
                    preferred_element_type=jnp.float32) + b
        return _leaky_relu(y) if act else y

    h = layer(h, w1, b1, True)
    h = layer(h, w2, b2, True)
    h = layer(h, w3, b3, True)
    return layer(h, w4, b4, False)


if __name__ == "__main__":
    key = jax.random.PRNGKey(0)
    B, C, L = 2, 4, 16                       # input_size = C * L = 64
    input_size = C * L

    kx, kp = jax.random.split(key)
    x = jax.random.normal(kx, (B, C, L), jnp.float32)
    params = init_params(kp, input_size)

    out = mlp_forward(x, params)
    out = jax.block_until_ready(out)

    ref = reference_forward(x, params)
    assert out.shape == (B, 2), out.shape
    assert jnp.allclose(out, ref, atol=1e-3, rtol=1e-3), (out, ref)

    print("KERNEL_OK")
</pallas_src>

<mosaic_0001>
module attributes {stable_mosaic.version = 11 : i64} {
  func.func @mlp_kernel(%arg0: i32, %arg1: memref<16x64xf32, #tpu.memory_space<vmem>>, %arg2: memref<64x128xbf16, #tpu.memory_space<vmem>>, %arg3: memref<1x128xf32, #tpu.memory_space<vmem>>, %arg4: memref<128x128xbf16, #tpu.memory_space<vmem>>, %arg5: memref<1x128xf32, #tpu.memory_space<vmem>>, %arg6: memref<128x128xbf16, #tpu.memory_space<vmem>>, %arg7: memref<1x128xf32, #tpu.memory_space<vmem>>, %arg8: memref<128x8xbf16, #tpu.memory_space<vmem>>, %arg9: memref<1x8xf32, #tpu.memory_space<vmem>>, %arg10: memref<16x8xf32, #tpu.memory_space<vmem>>) attributes {dimension_semantics = [#tpu.dimension_semantics<parallel>], iteration_bounds = array<i64: 1>, scalar_prefetch = 0 : i64, scratch_operands = 0 : i64, tpu.core_type = #tpu.core_type<tc>, window_params = [{transform_indices = @transform_0, window_bounds = array<i64: 16, 64>}, {pipeline_mode = #tpu.pipeline_mode<synchronous>, transform_indices = @transform_1, window_bounds = array<i64: 64, 128>}, {pipeline_mode = #tpu.pipeline_mode<synchronous>, transform_indices = @transform_2, window_bounds = array<i64: 1, 128>}, {pipeline_mode = #tpu.pipeline_mode<synchronous>, transform_indices = @transform_3, window_bounds = array<i64: 128, 128>}, {pipeline_mode = #tpu.pipeline_mode<synchronous>, transform_indices = @transform_4, window_bounds = array<i64: 1, 128>}, {pipeline_mode = #tpu.pipeline_mode<synchronous>, transform_indices = @transform_5, window_bounds = array<i64: 128, 128>}, {pipeline_mode = #tpu.pipeline_mode<synchronous>, transform_indices = @transform_6, window_bounds = array<i64: 1, 128>}, {pipeline_mode = #tpu.pipeline_mode<synchronous>, transform_indices = @transform_7, window_bounds = array<i64: 128, 8>}, {pipeline_mode = #tpu.pipeline_mode<synchronous>, transform_indices = @transform_8, window_bounds = array<i64: 1, 8>}, {transform_indices = @transform_9, window_bounds = array<i64: 16, 8>}]} {
    %c0 = arith.constant 0 : index
    %c0_0 = arith.constant 0 : index
    %0 = vector.load %arg1[%c0, %c0_0] : memref<16x64xf32, #tpu.memory_space<vmem>>, vector<16x64xf32>
    %1 = arith.truncf %0 : vector<16x64xf32> to vector<16x64xbf16>
    %c0_1 = arith.constant 0 : index
    %c0_2 = arith.constant 0 : index
    %2 = vector.load %arg2[%c0_1, %c0_2] : memref<64x128xbf16, #tpu.memory_space<vmem>>, vector<64x128xbf16>
    %cst = arith.constant dense<0.000000e+00> : vector<16x128xf32>
    %3 = tpu.matmul %1, %2, %cst {dimension_numbers = #tpu.dot_dimension_numbers<[1], [0], [0], [1], [0, 0, 1, 1], [], []>} : vector<16x64xbf16>, vector<64x128xbf16>, vector<16x128xf32> -> vector<16x128xf32>
    %c0_3 = arith.constant 0 : index
    %c0_4 = arith.constant 0 : index
    %4 = vector.load %arg3[%c0_3, %c0_4] : memref<1x128xf32, #tpu.memory_space<vmem>>, vector<1x128xf32>
    %5 = vector.broadcast %4 : vector<1x128xf32> to vector<16x128xf32>
    %6 = arith.addf %3, %5 : vector<16x128xf32>
    %cst_5 = arith.constant 0.000000e+00 : f32
    %7 = vector.broadcast %cst_5 : f32 to vector<16x128xf32>
    %8 = arith.cmpf oge, %6, %7 : vector<16x128xf32>
    %cst_6 = arith.constant 0.00999999977 : f32
    %9 = vector.broadcast %cst_6 : f32 to vector<16x128xf32>
    %10 = arith.mulf %9, %6 : vector<16x128xf32>
    %11 = arith.select %8, %6, %10 : vector<16x128xi1>, vector<16x128xf32>
    %12 = arith.truncf %11 : vector<16x128xf32> to vector<16x128xbf16>
    %c0_7 = arith.constant 0 : index
    %c0_8 = arith.constant 0 : index
    %13 = vector.load %arg4[%c0_7, %c0_8] : memref<128x128xbf16, #tpu.memory_space<vmem>>, vector<128x128xbf16>
    %cst_9 = arith.constant dense<0.000000e+00> : vector<16x128xf32>
    %14 = tpu.matmul %12, %13, %cst_9 {dimension_numbers = #tpu.dot_dimension_numbers<[1], [0], [0], [1], [0, 0, 1, 1], [], []>} : vector<16x128xbf16>, vector<128x128xbf16>, vector<16x128xf32> -> vector<16x128xf32>
    %c0_10 = arith.constant 0 : index
    %c0_11 = arith.constant 0 : index
    %15 = vector.load %arg5[%c0_10, %c0_11] : memref<1x128xf32, #tpu.memory_space<vmem>>, vector<1x128xf32>
    %16 = vector.broadcast %15 : vector<1x128xf32> to vector<16x128xf32>
    %17 = arith.addf %14, %16 : vector<16x128xf32>
    %cst_12 = arith.constant 0.000000e+00 : f32
    %18 = vector.broadcast %cst_12 : f32 to vector<16x128xf32>
    %19 = arith.cmpf oge, %17, %18 : vector<16x128xf32>
    %cst_13 = arith.constant 0.00999999977 : f32
    %20 = vector.broadcast %cst_13 : f32 to vector<16x128xf32>
    %21 = arith.mulf %20, %17 : vector<16x128xf32>
    %22 = arith.select %19, %17, %21 : vector<16x128xi1>, vector<16x128xf32>
    %23 = arith.truncf %22 : vector<16x128xf32> to vector<16x128xbf16>
    %c0_14 = arith.constant 0 : index
    %c0_15 = arith.constant 0 : index
    %24 = vector.load %arg6[%c0_14, %c0_15] : memref<128x128xbf16, #tpu.memory_space<vmem>>, vector<128x128xbf16>
    %cst_16 = arith.constant dense<0.000000e+00> : vector<16x128xf32>
    %25 = tpu.matmul %23, %24, %cst_16 {dimension_numbers = #tpu.dot_dimension_numbers<[1], [0], [0], [1], [0, 0, 1, 1], [], []>} : vector<16x128xbf16>, vector<128x128xbf16>, vector<16x128xf32> -> vector<16x128xf32>
    %c0_17 = arith.constant 0 : index
    %c0_18 = arith.constant 0 : index
    %26 = vector.load %arg7[%c0_17, %c0_18] : memref<1x128xf32, #tpu.memory_space<vmem>>, vector<1x128xf32>
    %27 = vector.broadcast %26 : vector<1x128xf32> to vector<16x128xf32>
    %28 = arith.addf %25, %27 : vector<16x128xf32>
    %cst_19 = arith.constant 0.000000e+00 : f32
    %29 = vector.broadcast %cst_19 : f32 to vector<16x128xf32>
    %30 = arith.cmpf oge, %28, %29 : vector<16x128xf32>
    %cst_20 = arith.constant 0.00999999977 : f32
    %31 = vector.broadcast %cst_20 : f32 to vector<16x128xf32>
    %32 = arith.mulf %31, %28 : vector<16x128xf32>
    %33 = arith.select %30, %28, %32 : vector<16x128xi1>, vector<16x128xf32>
    %34 = arith.truncf %33 : vector<16x128xf32> to vector<16x128xbf16>
    %c0_21 = arith.constant 0 : index
    %c0_22 = arith.constant 0 : index
    %35 = vector.load %arg8[%c0_21, %c0_22] : memref<128x8xbf16, #tpu.memory_space<vmem>>, vector<128x8xbf16>
    %cst_23 = arith.constant dense<0.000000e+00> : vector<16x8xf32>
    %36 = tpu.matmul %34, %35, %cst_23 {dimension_numbers = #tpu.dot_dimension_numbers<[1], [0], [0], [1], [0, 0, 1, 1], [], []>} : vector<16x128xbf16>, vector<128x8xbf16>, vector<16x8xf32> -> vector<16x8xf32>
    %c0_24 = arith.constant 0 : index
    %c0_25 = arith.constant 0 : index
    %37 = vector.load %arg9[%c0_24, %c0_25] : memref<1x8xf32, #tpu.memory_space<vmem>>, vector<1x8xf32>
    %38 = vector.broadcast %37 : vector<1x8xf32> to vector<16x8xf32>
    %39 = arith.addf %36, %38 : vector<16x8xf32>
    %c0_26 = arith.constant 0 : index
    %c0_27 = arith.constant 0 : index
    %40 = vector.load %arg10[%c0_26, %c0_27] : memref<16x8xf32, #tpu.memory_space<vmem>>, vector<16x8xf32>
    tpu.vector_store %arg10[%c0_26, %c0_27], %39 {strides = array<i32>} : memref<16x8xf32, #tpu.memory_space<vmem>>, vector<16x8xf32>,
    return
  }
  func.func @transform_0(%arg0: i32) -> (i32, i32) {
    %c0_i32 = arith.constant 0 : i32
    %c0_i32_0 = arith.constant 0 : i32
    return %arg0, %c0_i32 : i32, i32
  }
  func.func @transform_1(%arg0: i32) -> (i32, i32) {
    %c0_i32 = arith.constant 0 : i32
    %c0_i32_0 = arith.constant 0 : i32
    %c0_i32_1 = arith.constant 0 : i32
    return %c0_i32, %c0_i32_0 : i32, i32
  }
  func.func @transform_2(%arg0: i32) -> (i32, i32) {
    %c0_i32 = arith.constant 0 : i32
    %c0_i32_0 = arith.constant 0 : i32
    %c0_i32_1 = arith.constant 0 : i32
    return %c0_i32, %c0_i32_0 : i32, i32
  }
  func.func @transform_3(%arg0: i32) -> (i32, i32) {
    %c0_i32 = arith.constant 0 : i32
    %c0_i32_0 = arith.constant 0 : i32
    %c0_i32_1 = arith.constant 0 : i32
    return %c0_i32, %c0_i32_0 : i32, i32
  }
  func.func @transform_4(%arg0: i32) -> (i32, i32) {
    %c0_i32 = arith.constant 0 : i32
    %c0_i32_0 = arith.constant 0 : i32
    %c0_i32_1 = arith.constant 0 : i32
    return %c0_i32, %c0_i32_0 : i32, i32
  }
  func.func @transform_5(%arg0: i32) -> (i32, i32) {
    %c0_i32 = arith.constant 0 : i32
    %c0_i32_0 = arith.constant 0 : i32
    %c0_i32_1 = arith.constant 0 : i32
    return %c0_i32, %c0_i32_0 : i32, i32
  }
  func.func @transform_6(%arg0: i32) -> (i32, i32) {
    %c0_i32 = arith.constant 0 : i32
    %c0_i32_0 = arith.constant 0 : i32
    %c0_i32_1 = arith.constant 0 : i32
    return %c0_i32, %c0_i32_0 : i32, i32
  }
  func.func @transform_7(%arg0: i32) -> (i32, i32) {
    %c0_i32 = arith.constant 0 : i32
    %c0_i32_0 = arith.constant 0 : i32
    %c0_i32_1 = arith.constant 0 : i32
    return %c0_i32, %c0_i32_0 : i32, i32
  }
  func.func @transform_8(%arg0: i32) -> (i32, i32) {
    %c0_i32 = arith.constant 0 : i32
    %c0_i32_0 = arith.constant 0 : i32
    %c0_i32_1 = arith.constant 0 : i32
    return %c0_i32, %c0_i32_0 : i32, i32
  }
  func.func @transform_9(%arg0: i32) -> (i32, i32) {
    %c0_i32 = arith.constant 0 : i32
    %c0_i32_0 = arith.constant 0 : i32
    return %arg0, %c0_i32 : i32, i32
  }
}

</mosaic_0001>

<bundles_post_ra>
// kernel: tpu_custom_call.1
= control target key start
LH: loop header
LB: loop body
LE: loop exit
PB: predicated region body
PF: predicated region fallthrough
CT: control target
= control target key end

     0   :  { %14 = vsyncpa [#allocation3], 0  ;;  %s974_s0 = inlined_call_operand.hbm [shape: f32[16,64], index: 0, kind: input, shape index: {}]   ;;  %s975_s1 = inlined_call_operand.hbm [shape: bf16[64,128], index: 1, kind: input, shape index: {}]   ;;  %s976_s2 = inlined_call_operand.vmem [shape: f32[1,128], index: 2, kind: input, shape index: {}]   ;;  %s977_s3 = inlined_call_operand.vmem [shape: bf16[128,128], index: 3, kind: input, shape index: {}]   ;;  %s978_s4 = inlined_call_operand.vmem [shape: f32[1,128], index: 4, kind: input, shape index: {}]   ;;  %s979_s5 = inlined_call_operand.hbm [shape: bf16[128,128], index: 5, kind: input, shape index: {}]   ;;  %s980_s6 = inlined_call_operand.vmem [shape: f32[1,128], index: 6, kind: input, shape index: {}]   ;;  %s981_s7 = inlined_call_operand.vmem [shape: bf16[128,8], index: 7, kind: input, shape index: {}]   ;;  %s982_s8 = inlined_call_operand.vmem [shape: f32[1,8], index: 8, kind: input, shape index: {}]   ;;  %s983_s9 = inlined_call_operand.vmem [shape: f32[16,8], index: 9, kind: output, shape index: {}]  }
   0x1   :  { %15 = vsyncpa [#allocation5], 0  ;;  %s771_s30 = smov [#allocation4]   ;;  %s701_s13 = scalar_lea.hbm %s975_s1, 512 }
   0x2   :  { %s33_s10 = sshll.u32 %s771_s30, 4  ;;  %p702_p0 = scmp.ne.s32.totalorder %s975_s1, %s701_s13  ;;  %s34_s10 = int_to_ptr.vmem [resolvable:$true] %s33_s10 }
   0x3   :  { %p705_p1 = scmp.lt.u32.totalorder %s701_s13, %s975_s1 }
   0x5   :  { %p707_p2 = pnand %p705_p1, %p702_p0 }
   0x7   :  { %710 = shalt.err (!%p707_p2)
}
   0x8   :  { %s711_s18 = scalar_lea.vmem %s34_s10, 512  ;;  %p716_p4 = scmp.lt.s32.totalorder %s34_s10, %s34_s10 }
   0x9   :  { %p712_p3 = scmp.ne.s32.totalorder %s34_s10, %s711_s18  ;;  %p717_p5 = scmp.lt.s32.totalorder %s711_s18, %s711_s18 }
   0xb   :  { %p718_p6 = por %p717_p5, %p716_p4 }
   0xd   :  { %p719_p7 = pnand %p718_p6, %p712_p3 }
   0xf   :  { %722 = shalt.err (!%p719_p7)
}
  0x10   :  { %s772_s19 = smov 64   ;;  %s773_s20 = smov 4  }
  0x11   :  { %39 = dma.hbm_to_vmem [thread:$0]  %s975_s1, 512, %s34_s10, [#allocation5], %s772_s19, %s772_s19, %s773_s20  }
  0x12   :  { %s774_s23 = smov [#allocation2]   ;;  %s723_s27 = scalar_lea.hbm %s974_s0, 256 }
  0x13   :  { %s21_s24 = sshll.u32 %s774_s23, 4  ;;  %p724_p8 = scmp.ne.s32.totalorder %s974_s0, %s723_s27  ;;  %s22_s24 = int_to_ptr.vmem [resolvable:$true] %s21_s24 }
  0x14   :  { %p727_p9 = scmp.lt.u32.totalorder %s723_s27, %s974_s0 }
  0x16   :  { %p729_p10 = pnand %p727_p9, %p724_p8 }
  0x18   :  { %732 = shalt.err (!%p729_p10)
}
  0x19   :  { %s733_s12 = scalar_lea.vmem %s22_s24, 256  ;;  %p738_p12 = scmp.lt.s32.totalorder %s22_s24, %s22_s24 }
  0x1a   :  { %p734_p11 = scmp.ne.s32.totalorder %s22_s24, %s733_s12  ;;  %p739_p13 = scmp.lt.s32.totalorder %s733_s12, %s733_s12 }
  0x1c   :  { %p740_p0 = por %p739_p13, %p738_p12 }
  0x1e   :  { %p741_p1 = pnand %p740_p0, %p734_p11 }
  0x20   :  { %744 = shalt.err (!%p741_p1)
}
  0x21   :  { %s775_s1 = smov 128   ;;  %s776_s10 = smov 8  }
  0x22   :  { %27 = dma.hbm_to_vmem [thread:$0]  %s974_s0, 256, %s22_s24, [#allocation3], %s775_s1, %s775_s1, %s776_s10  }
  0x23   :  { %s777_s15 = smov [#allocation6]   ;;  %s745_s21 = scalar_lea.hbm %s979_s5, 1024 }
  0x24   :  { %s51_s16 = sshll.u32 %s777_s15, 4  ;;  %p746_p2 = scmp.ne.s32.totalorder %s979_s5, %s745_s21  ;;  %s52_s16 = int_to_ptr.vmem [resolvable:$true] %s51_s16 }
  0x25   :  { %p749_p3 = scmp.lt.u32.totalorder %s745_s21, %s979_s5 }
  0x27   :  { %p751_p4 = pnand %p749_p3, %p746_p2 }
  0x29   :  { %754 = shalt.err (!%p751_p4)
}
  0x2a   :  { %s755_s27 = scalar_lea.vmem %s52_s16, 1024  ;;  %p760_p6 = scmp.lt.s32.totalorder %s52_s16, %s52_s16 }
  0x2b   :  { %p756_p5 = scmp.ne.s32.totalorder %s52_s16, %s755_s27  ;;  %p761_p7 = scmp.lt.s32.totalorder %s755_s27, %s755_s27 }
  0x2d   :  { %p762_p8 = por %p761_p7, %p760_p6 }
  0x2f   :  { %p763_p9 = pnand %p762_p8, %p756_p5 }
  0x31   :  { %766 = shalt.err (!%p763_p9)
}
  0x32   :  { %57 = dma.hbm_to_vmem [thread:$0]  %s979_s5, 1024, %s52_s16, [#allocation5], %s772_s19, %s772_s19, %s773_s20  }
  0x33   :  { %767 = dma.done.wait [#allocation3], 256  }
  0x34   :  { %768 = vsyncadd [#allocation3], 4294967040 }
  0x35   :  { %769 = dma.done.wait [#allocation5], 1536  }
  0x36   :  { %770 = vsyncadd [#allocation5], 4294965760  ;;  %v778_v0 = vmov 0.0   ;;  %vm779_vm0 = vmmov 0   ;;  %v673_v1 = vld [vmem:[#allocation4] sm:$0xff]   ;;  %v674_v2 = vld [vmem:[#allocation4 + $0x8] sm:$0xff]  }
  0x37   :  { %592 = vmatprep.subr.bf16.mxu0 %v778_v0  ;;  %600 = vmatprep.mubr.msk.bf16.mxu0 %vm779_vm0, %v778_v0  ;;  %v677_v3 = vld [vmem:[%s977_s3] sm:$0xff]   ;;  %v678_v5 = vld [vmem:[%s977_s3 + $0x8] sm:$0xff]   ;;  %vm116_vm1 = vcmask 523264   ;;  %v679_v9 = vld [vmem:[%s977_s3 + $0x10] sm:$0xff]   ;;  %vm518_vm8 = vcmask 64512  }
  0x38   :  { %604 = vmatprep.subr.bf16.mxu1 %v778_v0  ;;  %620 = vmatprep.mubr.msk.bf16.mxu1 %vm779_vm0, %v778_v0  ;;  %v675_v4 = vld [vmem:[#allocation4 + $0x10] sm:$0xff]   ;;  %v676_v6 = vld [vmem:[#allocation4 + $0x18] sm:$0xff]   ;;  %v680_v11 = vld [vmem:[%s977_s3 + $0x18] sm:$0xff]  }
  0x39   :  { %593 = vmatpush3.bf16.msra.mxu0 %v673_v1  ;;  %605 = vmatpush3.bf16.msra.mxu1 %v677_v3  ;;  %v74_v7 = vld [vmem:[#allocation2] sm:$0xff]  ;;  %v75_v8 = vld [vmem:[#allocation2 + $0x8] sm:$0xff]  ;;  %v683_v14 = vld [vmem:[%s977_s3 + $0x30] sm:$0xff]  }
  0x3a   :  { %594 = vmatprep.subr.bf16.mxu0 %v778_v0  ;;  %606 = vmatprep.subr.bf16.mxu1 %v778_v0  ;;  %v76_v10 = vpack.c.bf16 %v75_v8, %v74_v7  ;;  %v681_v12 = vld [vmem:[%s977_s3 + $0x20] sm:$0xff]   ;;  %v682_v13 = vld [vmem:[%s977_s3 + $0x28] sm:$0xff]   ;;  %v684_v15 = vld [vmem:[%s977_s3 + $0x38] sm:$0xff]  }
  0x3b   :  { %v685_v16 = vld [vmem:[#allocation6] sm:$0xff]   ;;  %v686_v17 = vld [vmem:[#allocation6 + $0x8] sm:$0xff]   ;;  %v687_v18 = vld [vmem:[#allocation6 + $0x10] sm:$0xff]  }
  0x3c   :  { %v688_v19 = vld [vmem:[#allocation6 + $0x18] sm:$0xff]   ;;  %v689_v20 = vld [vmem:[#allocation6 + $0x20] sm:$0xff]   ;;  %v690_v21 = vld [vmem:[#allocation6 + $0x28] sm:$0xff]  }
  0x3d   :  { %595 = vmatpush3.bf16.msra.mxu0 %v674_v2  ;;  %607 = vmatpush3.bf16.msra.mxu1 %v678_v5  ;;  %v527_v22 = vld [vmem:[%s976_s2] ss:$0 sm:$0xff]  ;;  %v692_v35 = vld [vmem:[#allocation6 + $0x38] sm:$0xff]   ;;  %v695_v38 = vld [vmem:[%s981_s7 + $0x10] sm:$0xff]  }
  0x3e   :  { %596 = vmatprep.subr.bf16.mxu0 %v778_v0  ;;  %608 = vmatprep.subr.bf16.mxu1 %v778_v0  ;;  %v691_v34 = vld [vmem:[#allocation6 + $0x30] sm:$0xff]   ;;  %v694_v37 = vld [vmem:[%s981_s7 + $0x8] sm:$0xff]   ;;  %v696_v39 = vld [vmem:[%s981_s7 + $0x18] sm:$0xff]  }
  0x3f   :  { %v693_v36 = vld [vmem:[%s981_s7] sm:$0xff]   ;;  %v698_v41 = vld [vmem:[%s981_s7 + $0x28] sm:$0xff]   ;;  %v699_v54 = vld [vmem:[%s981_s7 + $0x30] sm:$0xff]  }
  0x40   :  { %v697_v40 = vld [vmem:[%s981_s7 + $0x20] sm:$0xff]   ;;  %v700_v55 = vld [vmem:[%s981_s7 + $0x38] sm:$0xff]  }
  0x41   :  { %597 = vmatpush3.bf16.msra.mxu0 %v675_v4  ;;  %609 = vmatpush3.bf16.msra.mxu1 %v679_v9  ;;  %v533_v42 = vld [vmem:[%s978_s4] ss:$0 sm:$0xff] }
  0x42   :  { %598 = vmatprep.subr.bf16.mxu0 %v778_v0  ;;  %610 = vmatprep.subr.bf16.mxu1 %v778_v0  ;;  %v542_v56 = vld [vmem:[%s980_s6] ss:$0 sm:$0xff] }
  0x43   :  { %v551_v4 = vld [vmem:[%s982_s8] ss:$0 sm:$0xff] }
  0x45   :  { %599 = vmatpush3.bf16.msra.mxu0 %v676_v6  ;;  %611 = vmatpush3.bf16.msra.mxu1 %v680_v11 }
  0x46   :  { %624 = vmatprep.subr.bf16.mxu0 %v778_v0  ;;  %612 = vmatprep.subr.bf16.mxu1 %v778_v0 }
  0x48   :  { %601 = vmatmul.mubr.msk.bf16.vlgmr.msra.gmra.mrb[0].mxu0 %vm116_vm1, %v76_v10 }
  0x49   :  { %640 = vmatprep.mubr.msk.bf16.mxu0 %vm779_vm0, %v778_v0  ;;  %613 = vmatpush3.bf16.msra.mxu1 %v681_v12 }
  0x4a   :  { %614 = vmatprep.subr.bf16.mxu1 %v778_v0  ;;  %625 = vmatpush3.bf16.msra.mxu0 %v685_v16 }
  0x4b   :  { %626 = vmatprep.subr.bf16.mxu0 %v778_v0 }
  0x4d   :  { %615 = vmatpush3.bf16.msra.mxu1 %v682_v13 }
  0x4e   :  { %616 = vmatprep.subr.bf16.mxu1 %v778_v0  ;;  %627 = vmatpush3.bf16.msra.mxu0 %v686_v17 }
  0x4f   :  { %628 = vmatprep.subr.bf16.mxu0 %v778_v0 }
  0x51   :  { %617 = vmatpush3.bf16.msra.mxu1 %v683_v14 }
  0x52   :  { %618 = vmatprep.subr.bf16.mxu1 %v778_v0  ;;  %629 = vmatpush3.bf16.msra.mxu0 %v687_v18 }
  0x53   :  { %630 = vmatprep.subr.bf16.mxu0 %v778_v0 }
  0x55   :  { %619 = vmatpush3.bf16.msra.mxu1 %v684_v15 }
  0x56   :  { %644 = vmatprep.subr.bf16.mxu1 %v778_v0  ;;  %631 = vmatpush3.bf16.msra.mxu0 %v688_v19 }
  0x57   :  { %632 = vmatprep.subr.bf16.mxu0 %v778_v0 }
  0x5a   :  { %633 = vmatpush3.bf16.msra.mxu0 %v689_v20 }
  0x5b   :  { %634 = vmatprep.subr.bf16.mxu0 %v778_v0 }
  0x5e   :  { %635 = vmatpush3.bf16.msra.mxu0 %v690_v21 }
  0x5f   :  { %636 = vmatprep.subr.bf16.mxu0 %v778_v0 }
  0x62   :  { %637 = vmatpush3.bf16.msra.mxu0 %v691_v34 }
  0x63   :  { %638 = vmatprep.subr.bf16.mxu0 %v778_v0 }
  0x66   :  { %639 = vmatpush3.bf16.msra.mxu0 %v692_v35 }
 0x11b   :  { %v154_v23 = vpop.f32.mrb[0].mxu0 }
 0x11c   :  { %v155_v24 = vadd.f32 %v527_v22, %v154_v23  ;;  %v602_v25 = vpop.f32.mrb[1].mxu0 }
 0x11d   :  { %v157_v26 = vpop.f32.mrb[2].mxu0 }
 0x11e   :  { %v163_v27 = vmul.f32 0.01, %v155_v24  ;;  %v158_v28 = vadd.f32 %v527_v22, %v157_v26  ;;  %v603_v29 = vpop.f32.mrb[3].mxu0  ;;  %vm161_vm2 = vcmp.ge.f32.partialorder %v155_v24, 0.0 }
 0x120   :  { %vm162_vm3 = vcmp.ge.f32.partialorder %v158_v28, 0.0  ;;  %v164_v30 = vmul.f32 0.01, %v158_v28  ;;  %v165_v31 = vsel %vm161_vm2, %v155_v24, %v163_v27 }
 0x122   :  { %v166_v32 = vsel %vm162_vm3, %v158_v28, %v164_v30 }
 0x123   :  { %v167_v33 = vpack.c.bf16 %v166_v32, %v165_v31 }
 0x125   :  { %621 = vmatmul.mubr.bf16.vlgmr.msra.gmra.mrb[0].mxu1 %v167_v33 }
 0x126   :  { %660 = vmatprep.mubr.msk.bf16.mxu1 %vm779_vm0, %v778_v0  ;;  %645 = vmatpush3.bf16.msra.mxu1 %v693_v36 }
 0x127   :  { %646 = vmatprep.subr.bf16.mxu1 %v778_v0 }
 0x12a   :  { %647 = vmatpush3.bf16.msra.mxu1 %v694_v37 }
 0x12b   :  { %648 = vmatprep.subr.bf16.mxu1 %v778_v0 }
 0x12e   :  { %649 = vmatpush3.bf16.msra.mxu1 %v695_v38 }
 0x12f   :  { %650 = vmatprep.subr.bf16.mxu1 %v778_v0 }
 0x132   :  { %651 = vmatpush3.bf16.msra.mxu1 %v696_v39 }
 0x133   :  { %652 = vmatprep.subr.bf16.mxu1 %v778_v0 }
 0x136   :  { %653 = vmatpush3.bf16.msra.mxu1 %v697_v40 }
 0x137   :  { %654 = vmatprep.subr.bf16.mxu1 %v778_v0 }
 0x13a   :  { %655 = vmatpush3.bf16.msra.mxu1 %v698_v41 }
 0x13b   :  { %656 = vmatprep.subr.bf16.mxu1 %v778_v0 }
 0x13e   :  { %657 = vmatpush3.bf16.msra.mxu1 %v699_v54 }
 0x13f   :  { %658 = vmatprep.subr.bf16.mxu1 %v778_v0 }
 0x142   :  { %659 = vmatpush3.bf16.msra.mxu1 %v700_v55 }
 0x1f8   :  { %v273_v43 = vpop.f32.mrb[0].mxu1 }
 0x1f9   :  { %v274_v44 = vadd.f32 %v533_v42, %v273_v43  ;;  %v622_v45 = vpop.f32.mrb[1].mxu1 }
 0x1fa   :  { %v276_v46 = vpop.f32.mrb[2].mxu1 }
 0x1fb   :  { %v282_v47 = vmul.f32 0.01, %v274_v44  ;;  %v277_v48 = vadd.f32 %v533_v42, %v276_v46  ;;  %v623_v49 = vpop.f32.mrb[3].mxu1  ;;  %vm280_vm4 = vcmp.ge.f32.partialorder %v274_v44, 0.0 }
 0x1fd   :  { %vm281_vm5 = vcmp.ge.f32.partialorder %v277_v48, 0.0  ;;  %v283_v50 = vmul.f32 0.01, %v277_v48  ;;  %v284_v51 = vsel %vm280_vm4, %v274_v44, %v282_v47 }
 0x1ff   :  { %v285_v52 = vsel %vm281_vm5, %v277_v48, %v283_v50 }
 0x200   :  { %v286_v53 = vpack.c.bf16 %v285_v52, %v284_v51 }
 0x202   :  { %641 = vmatmul.mubr.bf16.vlgmr.msra.gmra.mrb[4].mxu0 %v286_v53 }
 0x2d5   :  { %v392_v57 = vpop.f32.mrb[4].mxu0 }
 0x2d6   :  { %v393_v58 = vadd.f32 %v542_v56, %v392_v57  ;;  %v642_v59 = vpop.f32.mrb[5].mxu0 }
 0x2d7   :  { %v395_v60 = vpop.f32.mrb[6].mxu0 }
 0x2d8   :  { %v401_v61 = vmul.f32 0.01, %v393_v58  ;;  %v396_v62 = vadd.f32 %v542_v56, %v395_v60  ;;  %v643_v63 = vpop.f32.mrb[7].mxu0  ;;  %vm399_vm6 = vcmp.ge.f32.partialorder %v393_v58, 0.0 }
 0x2da   :  { %vm400_vm7 = vcmp.ge.f32.partialorder %v396_v62, 0.0  ;;  %v402_v1 = vmul.f32 0.01, %v396_v62  ;;  %v403_v0 = vsel %vm399_vm6, %v393_v58, %v401_v61 }
 0x2dc   :  { %v404_v2 = vsel %vm400_vm7, %v396_v62, %v402_v1 }
 0x2dd   :  { %v405_v3 = vpack.c.bf16 %v404_v2, %v403_v0 }
 0x2df   :  { %661 = vmatmul.mubr.bf16.vlgmr.msra.gmra.mrb[4].mxu1 %v405_v3 }
 0x3b2   :  { %v511_v5 = vpop.f32.mrb[4].mxu1 }
 0x3b3   :  { %v512_v6 = vadd.f32 %v551_v4, %v511_v5  ;;  %v662_v7 = vpop.f32.mrb[5].mxu1 }
 0x3b4   :  { %v514_v8 = vpop.f32.mrb[6].mxu1 }
 0x3b5   :  { %519 = vst.msk [vmem:[%s983_s9] sm:$0xff] %vm518_vm8, %v512_v6  ;;  %v515_v9 = vadd.f32 %v551_v4, %v514_v8  ;;  %v663_v10 = vpop.f32.mrb[7].mxu1 }
 0x3b7   :  { %520 = vst.msk [vmem:[%s983_s9 + $0x8] sm:$0xff] %vm518_vm8, %v515_v9 }
 0x3b8   :  { %525 = vsyncpa [#allocation3], 1 }
 0x3b9   :  { %526 = vsyncpa [#allocation5], 1 }

</bundles_post_ra>
